<compile_context>
chip_gen: v5e
topology: v5e:2x2
jax: 0.10.0
libtpu: 0.0.40
codegen_flags: <defaults>
</compile_context>

<pallas_src>
import jax
import jax.numpy as jnp
from jax.experimental import pallas as pl
from jax.experimental.pallas import tpu as pltpu

TOKEN_SELF_ATTN_VALUE = -50000.0


# -------------------------- Pallas kernel (hot path) --------------------------
def _lsh_chunk_kernel(q_ref, k_ref, kh_ref, v_ref, vh_ref, pos_ref, ph_ref,
                      o_ref, lse_ref):
    q = q_ref[...]          # (TC, W, D)  bf16, pre-scaled by D**-0.5
    k = k_ref[...]          # (TC, W, D)  bf16, pre-L2-normalized
    v = v_ref[...]          # (TC, W, D)  bf16
    pos = pos_ref[...]      # (TC, 1, W)  int32 original token positions

    def with_look_back(cur, halo, axis):
        # prev[i] = cur[i-1]; prev[0] = halo chunk ((first chunk of this grid
        # block) - 1, wrapping to the last chunk) == reference look_one_back.
        if cur.shape[0] > 1:
            prev = jnp.concatenate([halo, cur[:-1]], axis=0)
        else:
            prev = halo
        return jnp.concatenate([cur, prev], axis=axis)

    k_win = with_look_back(k, kh_ref[...], axis=1)     # (TC, 2W, D)
    v_win = with_look_back(v, vh_ref[...], axis=1)     # (TC, 2W, D)
    kvt = with_look_back(pos, ph_ref[...], axis=2)     # (TC, 1, 2W)
    # Query positions derived from the lane-dense positions block (no extra
    # lane-padded (TC, W, 1) DMA stream).  Order-preserving reshape.
    qt = pos.reshape(pos.shape[0], pos.shape[2], 1)    # (TC, W, 1)

    # Batched QK^T over the chunk dim (MXU, f32 accumulation).
    dots = jnp.einsum('cwd,ckd->cwk', q, k_win,
                      preferred_element_type=jnp.float32)        # (TC, W, 2W)

    # Self-attention mask: a token never attends to its own position.
    dots = jnp.where(qt == kvt, TOKEN_SELF_ATTN_VALUE, dots)

    # Numerically stable softmax / logsumexp with a single exp pass.
    m = jnp.max(dots, axis=-1, keepdims=True)                    # (TC, W, 1)
    e = jnp.exp(dots - m)                                        # (TC, W, 2W)
    s = jnp.sum(e, axis=-1, keepdims=True)                       # (TC, W, 1)

    # Unnormalized PV on the MXU; normalize afterwards on the (TC, W, D) f32
    # accumulator (2W/D x fewer VPU multiplies than scaling the probabilities).
    o_un = jnp.einsum('cwk,ckd->cwd', e.astype(v.dtype), v_win,
                      preferred_element_type=jnp.float32)        # (TC, W, D)
    o_ref[...] = (o_un * pl.reciprocal(s, approx=True)).astype(o_ref.dtype)
    # lse is exact (m + log s); written lane-dense (flat) when the out layout is.
    lse_ref[...] = jnp.reshape(m + jnp.log(s), lse_ref.shape)


# -------------------------- VMEM planning helpers ------------------------------
def _ceil_to(x, m):
    return -(-x // m) * m


def _padded_bytes(outer, rows, cols, itemsize):
    """Bytes of a (outer, rows, cols) VMEM buffer including (8/16,128) tiling."""
    sub = 16 if itemsize == 2 else 8
    return outer * _ceil_to(max(rows, 1), sub) * _ceil_to(max(cols, 1), 128) * itemsize


def _estimate_vmem_bytes(TC, W, D):
    """Per-grid-step VMEM footprint incl. tile padding and live intermediates."""
    W2 = 2 * W
    dbl = 2  # BlockSpec double-buffering of pipelined inputs/outputs
    total = 0
    # Pipelined input blocks.
    total += dbl * _padded_bytes(TC, W, D, 2)        # q
    total += dbl * 2 * _padded_bytes(TC, W, D, 2)    # k, v (main)
    total += dbl * 2 * _padded_bytes(1, W, D, 2)     # k, v (halo)
    total += dbl * _padded_bytes(TC, 1, W, 4)        # positions
    total += dbl * _padded_bytes(1, 1, W, 4)         # positions halo
    # Pipelined output blocks.
    total += dbl * _padded_bytes(TC, W, D, 2)        # bo (bf16)
    total += dbl * _padded_bytes(1, 1, TC * W, 4)    # lse (f32)
    # Live in-kernel intermediates (single copy).
    total += 2 * _padded_bytes(TC, W2, D, 2)         # k_win, v_win
    total += 2 * _padded_bytes(TC, W, W2, 4)         # dots (+ masked copy)
    total += _padded_bytes(TC, W, W2, 4)             # e = exp(dots - m)
    total += _padded_bytes(TC, W, W2, 2)             # e cast to bf16
    total += _padded_bytes(TC, W, D, 4)              # unnormalized PV accumulator
    total += 2 * _padded_bytes(TC, W, 1, 4)          # m, s
    total += _padded_bytes(TC, 1, W2, 4)             # kvt
    return total


def _vmem_capacity_bytes():
    try:
        return int(pltpu.get_tpu_info().vmem_capacity_bytes)
    except Exception:
        return 64 * 1024 * 1024  # conservative (v7x per-TensorCore VMEM)


def _pick_chunk_block(B, C, W, D, budget_bytes):
    """Largest TC dividing C that fits the VMEM budget.

    Prefers TC values for which the flattened lse output block (TC*W lanes) is
    128-aligned (or covers the full C*W dim), so the lse store is lane-dense.
    Returns (TC, use_flat_lse_layout).
    """
    divisors = [t for t in range(1, C + 1) if C % t == 0]
    # Keep >= 2 grid programs only when the batch axis can't feed 2 TensorCores.
    if B == 1 and C >= 2:
        max_tc = max(1, C // 2)
    else:
        max_tc = C
    fit = [t for t in divisors
           if t <= max_tc and _estimate_vmem_bytes(t, W, D) <= budget_bytes]
    if not fit:
        fit = [1]
    aligned = [t for t in fit if (t * W) % 128 == 0 or t == C]
    if aligned:
        tc = max(aligned)
        flat = True
    else:
        tc = max(fit)
        flat = (tc * W) % 128 == 0 or tc == C
    return tc, flat


# ------------------------------ pallas_call wrapper -----------------------------
def lsh_chunk_attention(bq, bk, bv, bpos):
    """Chunk-batched LSH attention over a (B, C // TC) grid.

    bq   (B, C, W, D) bf16 query chunks, pre-scaled by D**-0.5
    bk   (B, C, W, D) bf16 L2-normalized key chunks (no look-back doubling)
    bv   (B, C, W, D) bf16 value chunks
    bpos (B, C, 1, W) int32 original token positions (lane-dense)

    Returns bo (B, C, W, D) bf16 and lse, either (B, 1, C*W) f32 (flat,
    lane-dense) or (B, C, 1, W) f32 (fallback layout).
    """
    B, C, W, D = bq.shape
    vmem_cap = _vmem_capacity_bytes()
    budget = int(vmem_cap * 0.45)
    TC, flat_lse = _pick_chunk_block(B, C, W, D, budget)
    grid = (B, C // TC)

    main_idx = lambda b, c: (b, c, 0, 0)
    # Halo block: chunk (c*TC - 1) mod C (chunk 0 wraps to chunk C-1, same as
    # the reference look_one_back).  Non-negative numerator for the modulo.
    halo_idx = lambda b, c, TC=TC, C=C: (b, (c * TC + C - 1) % C, 0, 0)

    in_specs = [
        pl.BlockSpec((None, TC, W, D), main_idx),     # q
        pl.BlockSpec((None, TC, W, D), main_idx),     # k (main)
        pl.BlockSpec((None, 1, W, D), halo_idx),      # k (halo)
        pl.BlockSpec((None, TC, W, D), main_idx),     # v (main)
        pl.BlockSpec((None, 1, W, D), halo_idx),      # v (halo)
        pl.BlockSpec((None, TC, 1, W), main_idx),     # positions (main)
        pl.BlockSpec((None, 1, 1, W), halo_idx),      # positions (halo)
    ]
    if flat_lse:
        lse_shape = jax.ShapeDtypeStruct((B, 1, C * W), jnp.float32)
        lse_spec = pl.BlockSpec((None, 1, TC * W), lambda b, c: (b, 0, c))
    else:
        lse_shape = jax.ShapeDtypeStruct((B, C, 1, W), jnp.float32)
        lse_spec = pl.BlockSpec((None, TC, 1, W), main_idx)

    out_shapes = (jax.ShapeDtypeStruct((B, C, W, D), jnp.bfloat16), lse_shape)
    out_specs = (pl.BlockSpec((None, TC, W, D), main_idx), lse_spec)

    W2 = 2 * W
    flops = 4 * B * C * W * W2 * D                 # two matmuls, 2*W*W2*D each
    transcendentals = B * C * W * (W2 + 2)         # exp + log + reciprocal
    halo = 1.0 + 1.0 / TC
    bytes_accessed = int(
        bq.size * bq.dtype.itemsize
        + (bk.size * bk.dtype.itemsize
           + bv.size * bv.dtype.itemsize
           + bpos.size * bpos.dtype.itemsize) * halo
        + B * C * W * D * 2                        # bo bf16
        + B * C * W * 4)                           # lse f32

    return pl.pallas_call(
        _lsh_chunk_kernel,
        out_shape=out_shapes,
        grid=grid,
        in_specs=in_specs,
        out_specs=out_specs,
        compiler_params=pltpu.CompilerParams(
            dimension_semantics=("parallel", "parallel"),
            vmem_limit_bytes=int(vmem_cap * 0.70)),
        cost_estimate=pl.CostEstimate(
            flops=flops,
            transcendentals=transcendentals,
            bytes_accessed=bytes_accessed),
    )(bq, bk, bk, bv, bv, bpos, bpos)


# ----------------------------- LSHAttention glue -------------------------------
class LSHAttentionPallas:
    """JAX/Pallas port of LSHAttention.forward (default config, eval mode)."""

    def __init__(self, bucket_size=64, n_hashes=8, causal=False):
        # TODO(synk): causal / input_mask / input_attn_mask /
        #   attend_across_buckets=False / allow_duplicate_attention=False /
        #   return_attn / dropout branches are off by default and not implemented.
        assert not causal
        self.bucket_size = bucket_size
        self.n_hashes = n_hashes

    def hash_vectors(self, n_buckets, vecs, key):
        B, T, F = vecs.shape
        assert n_buckets % 2 == 0
        # random_rotations_per_head=False -> shared rotations, broadcast over batch
        rot_shape = (1, F, self.n_hashes, n_buckets // 2)
        random_rotations = jax.random.normal(key, rot_shape, dtype=vecs.dtype)
        random_rotations = jnp.broadcast_to(random_rotations, (B,) + rot_shape[1:])
        rotated = jnp.einsum('btf,bfhi->bhti', vecs, random_rotations)
        rotated = jnp.concatenate([rotated, -rotated], axis=-1)
        buckets = jnp.argmax(rotated, axis=-1).astype(jnp.int32)      # (B, H, T)
        offsets = (jnp.arange(self.n_hashes, dtype=jnp.int32) * n_buckets)
        buckets = buckets + offsets.reshape(1, -1, 1)
        return buckets.reshape(B, -1)                                  # (B, H*T)

    def __call__(self, qk, v, rot_key):
        B, T, D = qk.shape
        H = self.n_hashes
        assert T % (self.bucket_size * 2) == 0
        n_buckets = T // self.bucket_size

        buckets = self.hash_vectors(n_buckets, qk, rot_key)            # (B, H*T)

        ticker = jnp.broadcast_to(
            jnp.arange(H * T, dtype=jnp.int32)[None, :], buckets.shape)
        buckets_and_t = T * buckets + (ticker % T)
        sticker = jnp.argsort(buckets_and_t, axis=-1).astype(jnp.int32)
        undo_sort = jnp.argsort(sticker, axis=-1).astype(jnp.int32)

        st = sticker % T                                               # (B, H*T)
        sqk = jnp.take_along_axis(qk, st[:, :, None], axis=1)
        sv = jnp.take_along_axis(v, st[:, :, None], axis=1)

        C = H * n_buckets
        W = self.bucket_size
        scale = float(D) ** -0.5

        bqk = sqk.reshape(B, C, W, D)
        bv = sv.reshape(B, C, W, D)
        # Positions lane-dense: (B, C, 1, W).  No look_one_back in the wrapper:
        # the kernel fetches the one-chunk halo and builds the 2W windows itself.
        bpos = st.reshape(B, C, 1, W).astype(jnp.int32)

        # Key L2-normalization hoisted out of the kernel (F.normalize, eps=1e-12),
        # then cast straight to bf16 (no widened arrays materialized).
        k_norm = jnp.sqrt(jnp.sum(jnp.square(bqk), axis=-1, keepdims=True))
        bk = (bqk / jnp.maximum(k_norm, 1e-12)).astype(jnp.bfloat16)
        # 1/sqrt(D) scale folded into q at cast time.
        bq = (bqk * scale).astype(jnp.bfloat16)
        bvb = bv.astype(jnp.bfloat16)

        bo, lse = lsh_chunk_attention(bq, bk, bvb, bpos)

        so = bo.reshape(B, -1, D)                                      # (B, H*T, D) bf16
        slogits = lse.reshape(B, -1)                                   # (B, H*T)   f32
        o = jnp.take_along_axis(so, undo_sort[:, :, None], axis=1)
        logits = jnp.take_along_axis(slogits, undo_sort, axis=1)
        o = o.reshape(B, H, T, D)
        logits = logits.reshape(B, H, T, 1)

        # Cross-hash combine in f32.
        probs = jnp.exp(
            logits - jax.scipy.special.logsumexp(logits, axis=1, keepdims=True))
        out = jnp.sum(o.astype(jnp.float32) * probs, axis=1)           # (B, T, D)
        attn = jnp.zeros((0,), dtype=out.dtype)                        # return_attn=False
        return out, attn, buckets


if __name__ == "__main__":
    key = jax.random.PRNGKey(0)
    k_qk, k_v, k_rot = jax.random.split(key, 3)

    B, T, D = 2, 32, 16           # seqlen divisible by bucket_size * 2
    bucket_size, n_hashes = 8, 2

    qk = jax.random.normal(k_qk, (B, T, D), dtype=jnp.float32)
    v = jax.random.normal(k_v, (B, T, D), dtype=jnp.float32)

    attn_module = LSHAttentionPallas(bucket_size=bucket_size, n_hashes=n_hashes,
                                     causal=False)
    out, attn, buckets = attn_module(qk, v, k_rot)
    jax.block_until_ready(out)
    assert out.shape == (B, T, D)
    assert buckets.shape == (B, n_hashes * T)
    assert bool(jnp.all(jnp.isfinite(out)))
    print("KERNEL_OK")
</pallas_src>

<mosaic_0001>
module attributes {stable_mosaic.version = 11 : i64} {
  func.func @_lsh_chunk_kernel(%arg0: i32, %arg1: i32, %arg2: memref<1x8x8x16xbf16, #tpu.memory_space<vmem>>, %arg3: memref<1x8x8x16xbf16, #tpu.memory_space<vmem>>, %arg4: memref<1x1x8x16xbf16, #tpu.memory_space<vmem>>, %arg5: memref<1x8x8x16xbf16, #tpu.memory_space<vmem>>, %arg6: memref<1x1x8x16xbf16, #tpu.memory_space<vmem>>, %arg7: memref<1x8x1x8xi32, #tpu.memory_space<vmem>>, %arg8: memref<1x1x1x8xi32, #tpu.memory_space<vmem>>, %arg9: memref<1x8x8x16xbf16, #tpu.memory_space<vmem>>, %arg10: memref<1x1x64xf32, #tpu.memory_space<vmem>>) attributes {dimension_semantics = [#tpu.dimension_semantics<parallel>, #tpu.dimension_semantics<parallel>], iteration_bounds = array<i64: 2, 1>, scalar_prefetch = 0 : i64, scratch_operands = 0 : i64, tpu.core_type = #tpu.core_type<tc>, window_params = [{transform_indices = @transform_0, window_bounds = array<i64: 1, 8, 8, 16>}, {transform_indices = @transform_1, window_bounds = array<i64: 1, 8, 8, 16>}, {transform_indices = @transform_2, window_bounds = array<i64: 1, 1, 8, 16>}, {transform_indices = @transform_3, window_bounds = array<i64: 1, 8, 8, 16>}, {transform_indices = @transform_4, window_bounds = array<i64: 1, 1, 8, 16>}, {transform_indices = @transform_5, window_bounds = array<i64: 1, 8, 1, 8>}, {transform_indices = @transform_6, window_bounds = array<i64: 1, 1, 1, 8>}, {transform_indices = @transform_7, window_bounds = array<i64: 1, 8, 8, 16>}, {transform_indices = @transform_8, window_bounds = array<i64: 1, 1, 64>}]} {
    %c0 = arith.constant 0 : index
    %c0_0 = arith.constant 0 : index
    %c0_1 = arith.constant 0 : index
    %c0_2 = arith.constant 0 : index
    %0 = vector.load %arg2[%c0, %c0_0, %c0_1, %c0_2] : memref<1x8x8x16xbf16, #tpu.memory_space<vmem>>, vector<1x8x8x16xbf16>
    %1 = vector.shape_cast %0 : vector<1x8x8x16xbf16> to vector<8x8x16xbf16>
    %c0_3 = arith.constant 0 : index
    %c0_4 = arith.constant 0 : index
    %c0_5 = arith.constant 0 : index
    %c0_6 = arith.constant 0 : index
    %2 = vector.load %arg3[%c0_3, %c0_4, %c0_5, %c0_6] : memref<1x8x8x16xbf16, #tpu.memory_space<vmem>>, vector<1x8x8x16xbf16>
    %3 = vector.shape_cast %2 : vector<1x8x8x16xbf16> to vector<8x8x16xbf16>
    %c0_7 = arith.constant 0 : index
    %c0_8 = arith.constant 0 : index
    %c0_9 = arith.constant 0 : index
    %c0_10 = arith.constant 0 : index
    %4 = vector.load %arg5[%c0_7, %c0_8, %c0_9, %c0_10] : memref<1x8x8x16xbf16, #tpu.memory_space<vmem>>, vector<1x8x8x16xbf16>
    %5 = vector.shape_cast %4 : vector<1x8x8x16xbf16> to vector<8x8x16xbf16>
    %c0_11 = arith.constant 0 : index
    %c0_12 = arith.constant 0 : index
    %c0_13 = arith.constant 0 : index
    %c0_14 = arith.constant 0 : index
    %6 = vector.load %arg7[%c0_11, %c0_12, %c0_13, %c0_14] : memref<1x8x1x8xi32, #tpu.memory_space<vmem>>, vector<1x8x1x8xi32>
    %7 = vector.shape_cast %6 : vector<1x8x1x8xi32> to vector<8x1x8xi32>
    %c0_15 = arith.constant 0 : index
    %c0_16 = arith.constant 0 : index
    %c0_17 = arith.constant 0 : index
    %c0_18 = arith.constant 0 : index
    %8 = vector.load %arg4[%c0_15, %c0_16, %c0_17, %c0_18] : memref<1x1x8x16xbf16, #tpu.memory_space<vmem>>, vector<1x1x8x16xbf16>
    %9 = vector.shape_cast %8 : vector<1x1x8x16xbf16> to vector<1x8x16xbf16>
    %10 = vector.extract_strided_slice %3 {offsets = [0, 0, 0], sizes = [7, 8, 16], strides = [1, 1, 1]} : vector<8x8x16xbf16> to vector<7x8x16xbf16>
    %11 = tpu.concatenate %9, %10 in 0 : vector<1x8x16xbf16>, vector<7x8x16xbf16> -> vector<8x8x16xbf16>
    %12 = tpu.concatenate %3, %11 in 1 : vector<8x8x16xbf16>, vector<8x8x16xbf16> -> vector<8x16x16xbf16>
    %c0_19 = arith.constant 0 : index
    %c0_20 = arith.constant 0 : index
    %c0_21 = arith.constant 0 : index
    %c0_22 = arith.constant 0 : index
    %13 = vector.load %arg6[%c0_19, %c0_20, %c0_21, %c0_22] : memref<1x1x8x16xbf16, #tpu.memory_space<vmem>>, vector<1x1x8x16xbf16>
    %14 = vector.shape_cast %13 : vector<1x1x8x16xbf16> to vector<1x8x16xbf16>
    %15 = vector.extract_strided_slice %5 {offsets = [0, 0, 0], sizes = [7, 8, 16], strides = [1, 1, 1]} : vector<8x8x16xbf16> to vector<7x8x16xbf16>
    %16 = tpu.concatenate %14, %15 in 0 : vector<1x8x16xbf16>, vector<7x8x16xbf16> -> vector<8x8x16xbf16>
    %17 = tpu.concatenate %5, %16 in 1 : vector<8x8x16xbf16>, vector<8x8x16xbf16> -> vector<8x16x16xbf16>
    %c0_23 = arith.constant 0 : index
    %c0_24 = arith.constant 0 : index
    %c0_25 = arith.constant 0 : index
    %c0_26 = arith.constant 0 : index
    %18 = vector.load %arg8[%c0_23, %c0_24, %c0_25, %c0_26] : memref<1x1x1x8xi32, #tpu.memory_space<vmem>>, vector<1x1x1x8xi32>
    %19 = vector.shape_cast %18 : vector<1x1x1x8xi32> to vector<1x1x8xi32>
    %20 = vector.extract_strided_slice %7 {offsets = [0, 0, 0], sizes = [7, 1, 8], strides = [1, 1, 1]} : vector<8x1x8xi32> to vector<7x1x8xi32>
    %21 = tpu.concatenate %19, %20 in 0 : vector<1x1x8xi32>, vector<7x1x8xi32> -> vector<8x1x8xi32>
    %22 = tpu.concatenate %7, %21 in 2 : vector<8x1x8xi32>, vector<8x1x8xi32> -> vector<8x1x16xi32>
    %23 = vector.shape_cast %7 : vector<8x1x8xi32> to vector<8x8x1xi32>
    "tpu.trace_start"() <{level = 10 : i32, message = "cwd,ckd->cwk"}> : () -> ()
    %cst = arith.constant dense<0.000000e+00> : vector<8x8x16xf32>
    %24 = tpu.matmul %1, %12, %cst {dimension_numbers = #tpu.dot_dimension_numbers<[2], [2], [1], [1], [0, 0, 0, 1, 1, 1], [0], [0]>} : vector<8x8x16xbf16>, vector<8x16x16xbf16>, vector<8x8x16xf32> -> vector<8x8x16xf32>
    "tpu.trace_stop"() : () -> ()
    %25 = vector.broadcast %23 : vector<8x8x1xi32> to vector<8x8x16xi32>
    %26 = vector.broadcast %22 : vector<8x1x16xi32> to vector<8x8x16xi32>
    %27 = arith.cmpi eq, %25, %26 : vector<8x8x16xi32>
    %cst_27 = arith.constant -5.000000e+04 : f32
    %28 = vector.broadcast %cst_27 : f32 to vector<8x8x16xf32>
    %29 = arith.select %27, %28, %24 : vector<8x8x16xi1>, vector<8x8x16xf32>
    %cst_28 = arith.constant dense<0xFF800000> : vector<8x8xf32>
    %30 = vector.multi_reduction <maximumf>, %29, %cst_28 [2] : vector<8x8x16xf32> to vector<8x8xf32>
    %31 = vector.shape_cast %30 : vector<8x8xf32> to vector<8x8x1xf32>
    %32 = vector.broadcast %31 : vector<8x8x1xf32> to vector<8x8x16xf32>
    %33 = arith.subf %29, %32 : vector<8x8x16xf32>
    %34 = math.exp %33 : vector<8x8x16xf32>
    %cst_29 = arith.constant dense<0.000000e+00> : vector<8x8xf32>
    %35 = vector.multi_reduction <add>, %34, %cst_29 [2] : vector<8x8x16xf32> to vector<8x8xf32>
    %36 = vector.shape_cast %35 : vector<8x8xf32> to vector<8x8x1xf32>
    %37 = arith.truncf %34 : vector<8x8x16xf32> to vector<8x8x16xbf16>
    "tpu.trace_start"() <{level = 10 : i32, message = "cwk,ckd->cwd"}> : () -> ()
    %cst_30 = arith.constant dense<0.000000e+00> : vector<8x8x16xf32>
    %38 = tpu.matmul %37, %17, %cst_30 {dimension_numbers = #tpu.dot_dimension_numbers<[2], [1], [1], [2], [0, 0, 0, 1, 1, 2], [0], [0]>} : vector<8x8x16xbf16>, vector<8x16x16xbf16>, vector<8x8x16xf32> -> vector<8x8x16xf32>
    "tpu.trace_stop"() : () -> ()
    %39 = tpu.reciprocal %36 {approx = true} : vector<8x8x1xf32> -> vector<8x8x1xf32>
    %40 = vector.broadcast %39 : vector<8x8x1xf32> to vector<8x8x16xf32>
    %41 = arith.mulf %38, %40 : vector<8x8x16xf32>
    %42 = arith.truncf %41 : vector<8x8x16xf32> to vector<8x8x16xbf16>
    %c0_31 = arith.constant 0 : index
    %c0_32 = arith.constant 0 : index
    %c0_33 = arith.constant 0 : index
    %c0_34 = arith.constant 0 : index
    %43 = vector.load %arg9[%c0_31, %c0_32, %c0_33, %c0_34] : memref<1x8x8x16xbf16, #tpu.memory_space<vmem>>, vector<1x8x8x16xbf16>
    %44 = vector.shape_cast %43 : vector<1x8x8x16xbf16> to vector<8x8x16xbf16>
    %45 = vector.shape_cast %42 : vector<8x8x16xbf16> to vector<1x8x8x16xbf16>
    tpu.vector_store %arg9[%c0_31, %c0_32, %c0_33, %c0_34], %45 {strides = array<i32>} : memref<1x8x8x16xbf16, #tpu.memory_space<vmem>>, vector<1x8x8x16xbf16>,
    %46 = math.log %36 : vector<8x8x1xf32>
    %47 = arith.addf %31, %46 : vector<8x8x1xf32>
    %48 = vector.shape_cast %47 : vector<8x8x1xf32> to vector<1x64xf32>
    %c0_35 = arith.constant 0 : index
    %c0_36 = arith.constant 0 : index
    %c0_37 = arith.constant 0 : index
    %49 = vector.load %arg10[%c0_35, %c0_36, %c0_37] : memref<1x1x64xf32, #tpu.memory_space<vmem>>, vector<1x1x64xf32>
    %50 = vector.shape_cast %49 : vector<1x1x64xf32> to vector<1x64xf32>
    %51 = vector.shape_cast %48 : vector<1x64xf32> to vector<1x1x64xf32>
    tpu.vector_store %arg10[%c0_35, %c0_36, %c0_37], %51 {strides = array<i32>} : memref<1x1x64xf32, #tpu.memory_space<vmem>>, vector<1x1x64xf32>,
    return
  }
  func.func @transform_0(%arg0: i32, %arg1: i32) -> (i32, i32, i32, i32) {
    %c0_i32 = arith.constant 0 : i32
    %c0_i32_0 = arith.constant 0 : i32
    %c0_i32_1 = arith.constant 0 : i32
    return %arg0, %arg1, %c0_i32, %c0_i32_0 : i32, i32, i32, i32
  }
  func.func @transform_1(%arg0: i32, %arg1: i32) -> (i32, i32, i32, i32) {
    %c0_i32 = arith.constant 0 : i32
    %c0_i32_0 = arith.constant 0 : i32
    %c0_i32_1 = arith.constant 0 : i32
    return %arg0, %arg1, %c0_i32, %c0_i32_0 : i32, i32, i32, i32
  }
  func.func @transform_2(%arg0: i32, %arg1: i32) -> (i32, i32, i32, i32) {
    %c8_i32 = arith.constant 8 : i32
    %0 = arith.muli %arg1, %c8_i32 : i32
    %c8_i32_0 = arith.constant 8 : i32
    %1 = arith.addi %0, %c8_i32_0 : i32
    %c1_i32 = arith.constant 1 : i32
    %2 = arith.subi %1, %c1_i32 : i32
    %c8_i32_1 = arith.constant 8 : i32
    %c0_i32 = arith.constant 0 : i32
    %3 = arith.cmpi eq, %c8_i32_1, %c0_i32 : i32
    %c1_i32_2 = arith.constant 1 : i32
    %4 = arith.select %3, %c1_i32_2, %c8_i32_1 : i32
    %5 = arith.remsi %2, %4 : i32
    %c0_i32_3 = arith.constant 0 : i32
    %6 = arith.cmpi ne, %5, %c0_i32_3 : i32
    %c0_i32_4 = arith.constant 0 : i32
    %7 = arith.cmpi slt, %5, %c0_i32_4 : i32
    %c0_i32_5 = arith.constant 0 : i32
    %8 = arith.cmpi slt, %4, %c0_i32_5 : i32
    %9 = arith.xori %7, %8 : i1
    %10 = arith.andi %9, %6 : i1
    %11 = arith.addi %5, %4 : i32
    %12 = arith.select %10, %11, %5 : i32
    %c0_i32_6 = arith.constant 0 : i32
    %c0_i32_7 = arith.constant 0 : i32
    %c0_i32_8 = arith.constant 0 : i32
    return %arg0, %12, %c0_i32_6, %c0_i32_7 : i32, i32, i32, i32
  }
  func.func @transform_3(%arg0: i32, %arg1: i32) -> (i32, i32, i32, i32) {
    %c0_i32 = arith.constant 0 : i32
    %c0_i32_0 = arith.constant 0 : i32
    %c0_i32_1 = arith.constant 0 : i32
    return %arg0, %arg1, %c0_i32, %c0_i32_0 : i32, i32, i32, i32
  }
  func.func @transform_4(%arg0: i32, %arg1: i32) -> (i32, i32, i32, i32) {
    %c8_i32 = arith.constant 8 : i32
    %0 = arith.muli %arg1, %c8_i32 : i32
    %c8_i32_0 = arith.constant 8 : i32
    %1 = arith.addi %0, %c8_i32_0 : i32
    %c1_i32 = arith.constant 1 : i32
    %2 = arith.subi %1, %c1_i32 : i32
    %c8_i32_1 = arith.constant 8 : i32
    %c0_i32 = arith.constant 0 : i32
    %3 = arith.cmpi eq, %c8_i32_1, %c0_i32 : i32
    %c1_i32_2 = arith.constant 1 : i32
    %4 = arith.select %3, %c1_i32_2, %c8_i32_1 : i32
    %5 = arith.remsi %2, %4 : i32
    %c0_i32_3 = arith.constant 0 : i32
    %6 = arith.cmpi ne, %5, %c0_i32_3 : i32
    %c0_i32_4 = arith.constant 0 : i32
    %7 = arith.cmpi slt, %5, %c0_i32_4 : i32
    %c0_i32_5 = arith.constant 0 : i32
    %8 = arith.cmpi slt, %4, %c0_i32_5 : i32
    %9 = arith.xori %7, %8 : i1
    %10 = arith.andi %9, %6 : i1
    %11 = arith.addi %5, %4 : i32
    %12 = arith.select %10, %11, %5 : i32
    %c0_i32_6 = arith.constant 0 : i32
    %c0_i32_7 = arith.constant 0 : i32
    %c0_i32_8 = arith.constant 0 : i32
    return %arg0, %12, %c0_i32_6, %c0_i32_7 : i32, i32, i32, i32
  }
  func.func @transform_5(%arg0: i32, %arg1: i32) -> (i32, i32, i32, i32) {
    %c0_i32 = arith.constant 0 : i32
    %c0_i32_0 = arith.constant 0 : i32
    %c0_i32_1 = arith.constant 0 : i32
    return %arg0, %arg1, %c0_i32, %c0_i32_0 : i32, i32, i32, i32
  }
  func.func @transform_6(%arg0: i32, %arg1: i32) -> (i32, i32, i32, i32) {
    %c8_i32 = arith.constant 8 : i32
    %0 = arith.muli %arg1, %c8_i32 : i32
    %c8_i32_0 = arith.constant 8 : i32
    %1 = arith.addi %0, %c8_i32_0 : i32
    %c1_i32 = arith.constant 1 : i32
    %2 = arith.subi %1, %c1_i32 : i32
    %c8_i32_1 = arith.constant 8 : i32
    %c0_i32 = arith.constant 0 : i32
    %3 = arith.cmpi eq, %c8_i32_1, %c0_i32 : i32
    %c1_i32_2 = arith.constant 1 : i32
    %4 = arith.select %3, %c1_i32_2, %c8_i32_1 : i32
    %5 = arith.remsi %2, %4 : i32
    %c0_i32_3 = arith.constant 0 : i32
    %6 = arith.cmpi ne, %5, %c0_i32_3 : i32
    %c0_i32_4 = arith.constant 0 : i32
    %7 = arith.cmpi slt, %5, %c0_i32_4 : i32
    %c0_i32_5 = arith.constant 0 : i32
    %8 = arith.cmpi slt, %4, %c0_i32_5 : i32
    %9 = arith.xori %7, %8 : i1
    %10 = arith.andi %9, %6 : i1
    %11 = arith.addi %5, %4 : i32
    %12 = arith.select %10, %11, %5 : i32
    %c0_i32_6 = arith.constant 0 : i32
    %c0_i32_7 = arith.constant 0 : i32
    %c0_i32_8 = arith.constant 0 : i32
    return %arg0, %12, %c0_i32_6, %c0_i32_7 : i32, i32, i32, i32
  }
  func.func @transform_7(%arg0: i32, %arg1: i32) -> (i32, i32, i32, i32) {
    %c0_i32 = arith.constant 0 : i32
    %c0_i32_0 = arith.constant 0 : i32
    %c0_i32_1 = arith.constant 0 : i32
    return %arg0, %arg1, %c0_i32, %c0_i32_0 : i32, i32, i32, i32
  }
  func.func @transform_8(%arg0: i32, %arg1: i32) -> (i32, i32, i32) {
    %c0_i32 = arith.constant 0 : i32
    %c0_i32_0 = arith.constant 0 : i32
    return %arg0, %c0_i32, %arg1 : i32, i32, i32
  }
}

</mosaic_0001>

<bundles_post_ra>
// kernel: tpu_custom_call.1
= control target key start
LH: loop header
LB: loop body
LE: loop exit
PB: predicated region body
PF: predicated region fallthrough
CT: control target
= control target key end

     0   :  { %s2885_s0 = inlined_call_operand.hbm [shape: bf16[2,8,8,16], index: 0, kind: input, shape index: {}]   ;;  %s2886_s1 = inlined_call_operand.hbm [shape: bf16[2,8,8,16], index: 1, kind: input, shape index: {}]   ;;  %s2887_s2 = inlined_call_operand.hbm [shape: bf16[2,8,8,16], index: 2, kind: input, shape index: {}]   ;;  %s2888_s3 = inlined_call_operand.hbm [shape: bf16[2,8,8,16], index: 3, kind: input, shape index: {}]   ;;  %s2889_s4 = inlined_call_operand.hbm [shape: bf16[2,8,8,16], index: 4, kind: input, shape index: {}]   ;;  %s2890_s5 = inlined_call_operand.hbm [shape: s32[2,8,1,8], index: 5, kind: input, shape index: {}]   ;;  %s2891_s6 = inlined_call_operand.hbm [shape: s32[2,8,1,8], index: 6, kind: input, shape index: {}]   ;;  %s2892_s7 = inlined_call_operand.hbm [shape: bf16[2,8,8,16], index: 7, kind: output, shape index: {0}]   ;;  %s2893_s8 = inlined_call_operand.hbm [shape: f32[2,1,64], index: 8, kind: output, shape index: {1}]  }
   0x1   :  { %2907 = sst [smem:[#allocation31_spill]] %s2886_s1 }
   0x2   :  { %2908 = sst [smem:[#allocation32_spill]] %s2888_s3 }
   0x3   :  { %2909 = sst [smem:[#allocation33_spill]] %s2892_s7 }
   0x4   :  { %2910 = sst [smem:[#allocation34_spill]] %s2893_s8 }
   0x5   :  { %14 = vsyncpa [#allocation3], 0 }
   0x6   :  { %16 = vsyncpa [#allocation3 + $0x1], 0 }
   0x7   :  { %17 = vsyncpa [#allocation6], 0 }
   0x8   :  { %19 = vsyncpa [#allocation6 + $0x1], 0 }
   0x9   :  { %20 = vsyncpa [#allocation9], 0 }
   0xa   :  { %22 = vsyncpa [#allocation9 + $0x1], 0 }
   0xb   :  { %23 = vsyncpa [#allocation12], 0 }
   0xc   :  { %25 = vsyncpa [#allocation12 + $0x1], 0 }
   0xd   :  { %26 = vsyncpa [#allocation4], 0 }
   0xe   :  { %28 = vsyncpa [#allocation4 + $0x1], 0 }
   0xf   :  { %29 = vsyncpa [#allocation16], 0 }
  0x10   :  { %31 = vsyncpa [#allocation16 + $0x1], 0  ;;  %s2387_s27 = smov 0   ;;  %s2389_s28 = smov 0  }
  0x11   :  { %s2391_s29 = smov 0   ;;  %s2393_s30 = smov 0  }
  0x12   :  { %s2395_s9 = smov 0   ;;  %s2397_s10 = smov 0  }
  0x13 LB: > { %2911 = sst [smem:[#allocation23_spill]] %s2313_s27  ;;  %s2418_s11 = sadd.s32 4294967295, %s2333_s10   ;;  %s2333_s10 = sphi %s2397_s10, %s37_s10   ;;  %s2329_s9 = sphi %s2395_s9, %s2942_s9   ;;  %s2325_s30 = sphi %s2393_s30, %s2941_s30   ;;  %s2321_s29 = sphi %s2391_s29, %s2937_s29   ;;  %s2317_s28 = sphi %s2389_s28, %s2940_s28   ;;  %s2313_s27 = sphi %s2387_s27, %s2939_s27  }
  0x14   : > { %2912 = sst [smem:[#allocation24_spill]] %s2321_s29  ;;  %s1773_s12 = sadd.s32 4294967294, %s2333_s10  }
  0x15   : > { %2913 = sst [smem:[#allocation25_spill]] %s2325_s30  ;;  %s49_s13 = sadd.s32 1, %s2329_s9 }
  0x16   : > { %2914 = sst [smem:[#allocation26_spill]] %s2333_s10  ;;  %s58_s14 = sadd.s32 1, %s2321_s29 }
  0x17   : > { %p51_p0 = scmp.ge.s32.totalorder %s49_s13, 2  ;;  %p65_p1 = scmp.ne.s32.totalorder %s2321_s29, %s2317_s28 }
  0x18   : > { %p66_p2 = scmp.eq.s32.totalorder %s2333_s10, 0  ;;  %p71_p3 = scmp.ne.s32.totalorder %s2317_s28, %s2313_s27 }
  0x19   : > { %s2944_s13 = smov (%p51_p0, %s49_s13), 0  ;;  %p72_p5 = scmp.eq.s32.totalorder %s2418_s11, 0 }
  0x1a   : > { %2915 = sst [smem:[#allocation27_spill]] %s2944_s13  ;;  %p2430_p4 = por %p66_p2, %p65_p1 }
  0x1b   : > { %s53_s16 = ssub.s32 %s2329_s9, %s2944_s13  ;;  %p349_p6 = scmp.eq.s32.totalorder %s2418_s11, 1 }
  0x1c   : > { %p56_p7 = scmp.eq.s32.totalorder %s53_s16, 0  ;;  %p2438_p8 = por %p72_p5, %p71_p3 }
  0x1d   : > { %p2442_p9 = por %p349_p6, %p65_p1  ;;  %p355_p10 = scmp.eq.s32.totalorder %s1773_s12, 1 }
  0x1e   : > { %s2447_s19 = scalar_select %p56_p7, %s2321_s29, %s58_s14  }
  0x1f   : > { %s2918_s18 = scalar_select %p2442_p9, 1, 0 }
  0x20   : > { %2920 = sst [smem:[#allocation29_spill]] %s2447_s19  ;;  %p2449_p11 = por %p355_p10, %p71_p3 }
  0x21   : > { %2919 = sst [smem:[#allocation28_spill]] %s2918_s18  ;;  %p1775_p12 = scmp.ge.s32.totalorder %s2333_s10, 2 }
  0x22   : > { %s2921_s20 = scalar_select %p2449_p11, 1, 0 }
  0x23   : > { %p1880_p13 = scmp.lt.s32.totalorder %s2333_s10, 2  ;;  %s2456_s21 = sand.u32 1, %s2321_s29  }
  0x24   : > { %2922 = sst [smem:[#allocation30_spill]] %s2921_s20  ;;  %s2459_s22 = sshll.u32 %s2456_s21, 5 }
  0x25   : > { %s2462_s23 = sshll.u32 %s2329_s9, 5  ;;  %p2466_p0 = pnand %p1880_p13, %p2430_p4 }
  0x26   : > { %s2471_s25 = sand.u32 1, %s2333_s10   ;;  %s2924_s1 = sld [smem:[#allocation31_spill]] }
  0x27   : > { %s431_s13 = scalar_lea.vmem [#allocation5], %s2459_s22  ;;  %s2900_s15 = scalar_lea.sflag [#allocation6], %s2471_s25 }
  0x28   : > { %s441_s19 = sshll.u32 %s431_s13, 4  ;;  %s2335_s29 = smov 64   ;;  %s442_s19 = int_to_ptr.vmem [resolvable:$true] %s441_s19 }
  0x29   : > { %s2336_s20 = smov 4   ;;  %p1794_p1 = scmp.ge.s32.totalorder %s2333_s10, 1 }
  0x2a   : > { %p599_p2 = scmp.lt.s32.totalorder %s2333_s10, 3  ;;  %s2926_s3 = sld [smem:[#allocation32_spill]] }
  0x2b   : > { %s490_s27 = scalar_lea.vmem [#allocation8], %s2459_s22  ;;  %s1792_s26 = sshll.u32 %s2329_s9, 3 }
  0x2c   : > { %s438_s14 = scalar_lea.hbm %s2924_s1, %s2462_s23  ;;  %p2488_p3 = pnand %p1794_p1, %p599_p2 }
  0x2d   : > { %s439_s16 = sshll.u32 %s438_s14, 4  ;;  %s500_s18 = sshll.u32 %s490_s27, 4  ;;  %s440_s16 = int_to_ptr.hbm [resolvable:$true] %s439_s16  ;;  %s501_s18 = int_to_ptr.vmem [resolvable:$true] %s500_s18 }
  0x2e   : > { %1857 = dma.hbm_to_vmem [thread:$0]  (!%p2466_p0), %s440_s16, 512, %s442_s19, %s2900_s15, %s2335_s29, %s2335_s29, %s2336_s20  }
  0x2f   : > { %s487_s19 = scalar_lea.sflag [#allocation9], %s2471_s25  ;;  %s1791_s16 = sshll.u32 %s2456_s21, 3 }
  0x30   : > { %s497_s14 = scalar_lea.hbm %s2926_s3, %s2462_s23  ;;  %s555_s27 = scalar_lea.hbm %s2890_s5, %s1792_s26 }
  0x31   : > { %s498_s1 = sshll.u32 %s497_s14, 4  ;;  %s549_s15 = scalar_lea.vmem [#allocation11], %s1791_s16  ;;  %s499_s1 = int_to_ptr.hbm [resolvable:$true] %s498_s1 }
  0x32   : > { %1863 = dma.hbm_to_vmem [thread:$0]  (!%p2466_p0), %s499_s1, 512, %s501_s18, %s487_s19, %s2335_s29, %s2335_s29, %s2336_s20  }
  0x33   : > { %s558_s3 = sshll.u32 %s549_s15, 4  ;;  %s556_s10 = sshll.u32 %s555_s27, 4  ;;  %s559_s3 = int_to_ptr.vmem [resolvable:$true] %s558_s3  ;;  %s557_s10 = int_to_ptr.hbm [resolvable:$true] %s556_s10 }
  0x34   : > { %s2906_s8 = scalar_lea.sflag [#allocation12], %s2471_s25  ;;  %s2337_s7 = smov 16  }
  0x35   : > { %s2338_s30 = smov 1   ;;  %s414_s12 = scalar_lea.hbm %s2885_s0, %s2462_s23 }
  0x36   : > { %1869 = dma.hbm_to_vmem [thread:$0]  (!%p2466_p0), %s557_s10, 128, %s559_s3, %s2906_s8, %s2337_s7, %s2337_s7, %s2338_s30  }
  0x37   : > { %s415_s16 = sshll.u32 %s414_s12, 4  ;;  %s407_s14 = scalar_lea.vmem [#allocation2], %s2459_s22  ;;  %s416_s16 = int_to_ptr.hbm [resolvable:$true] %s415_s16 }
  0x38   : > { %s417_s15 = sshll.u32 %s407_s14, 4  ;;  %s404_s27 = scalar_lea.sflag [#allocation3], %s2456_s21  ;;  %s418_s15 = int_to_ptr.vmem [resolvable:$true] %s417_s15 }
  0x39   : > { %1854 = dma.hbm_to_vmem [thread:$0]  (!%p2466_p0), %s416_s16, 512, %s418_s15, %s404_s27, %s2335_s29, %s2335_s29, %s2336_s20  }
  0x3a   : > { %s1782_s3 = sshll.u32 %s2456_s21, 2  ;;  %s1826_s7 = sadd.s32 28, %s2462_s23 }
  0x3b   : > { %s475_s1 = scalar_lea.hbm %s2887_s2, %s1826_s7  ;;  %s455_s18 = scalar_lea.vmem [#allocation7], %s1782_s3 }
  0x3c   : > { %s477_s22 = sshll.u32 %s475_s1, 4  ;;  %s479_s12 = sshll.u32 %s455_s18, 4  ;;  %s478_s22 = int_to_ptr.hbm [resolvable:$true] %s477_s22  ;;  %s480_s12 = int_to_ptr.vmem [resolvable:$true] %s479_s12 }
  0x3d   : > { %s2927_s14 = scalar_lea.sflag [#allocation6], %s2471_s25  ;;  %s534_s16 = scalar_lea.hbm %s2889_s4, %s1826_s7 }
  0x3e   : > { %1860 = dma.hbm_to_vmem [thread:$0]  (!%p2466_p0), %s478_s22, 64, %s480_s12, %s2927_s14  }
  0x3f   : > { %s536_s23 = sshll.u32 %s534_s16, 4  ;;  %s514_s15 = scalar_lea.vmem [#allocation10], %s1782_s3  ;;  %s537_s23 = int_to_ptr.hbm [resolvable:$true] %s536_s23 }
  0x40   : > { %s538_s27 = sshll.u32 %s514_s15, 4  ;;  %s589_s30 = sadd.s32 7, %s1792_s26  ;;  %s539_s27 = int_to_ptr.vmem [resolvable:$true] %s538_s27 }
  0x41   : > { %1866 = dma.hbm_to_vmem [thread:$0]  (!%p2466_p0), %s537_s23, 64, %s539_s27, %s487_s19  }
  0x42   : > { %s590_s18 = scalar_lea.hbm %s2891_s6, %s589_s30  ;;  %s571_s8 = scalar_lea.vmem [#allocation13], %s2456_s21 }
  0x43   : > { %s594_s22 = sshll.u32 %s571_s8, 4  ;;  %s592_s12 = sshll.u32 %s590_s18, 4  ;;  %s595_s22 = int_to_ptr.vmem [resolvable:$true] %s594_s22  ;;  %s593_s12 = int_to_ptr.hbm [resolvable:$true] %s592_s12 }
  0x44   : > { %s2928_s7 = scalar_lea.sflag [#allocation12], %s2471_s25  ;;  %603 = sbr.rel (%p2488_p3) target bundleno = 535 (0x217), region = 48 }
  0x45   : > { %1872 = dma.hbm_to_vmem [thread:$0]  (!%p2466_p0), %s593_s12, 16, %s595_s22, %s2928_s7  }
  0x46   : > { %s2557_s19 = sand.u32 (!%p2488_p3), 1, %s2317_s28  }
  0x47   : > { %s2560_s26 = sshll.u32 (!%p2488_p3), %s2557_s19, 5  ;;  %s606_s21 = scalar_lea.sflag (!%p2488_p3), [#allocation3], %s2557_s19 }
  0x48   : > { %s2564_s8 = scalar_lea.vmem (!%p2488_p3), [#allocation2], %s2560_s26 }
  0x49   : > { %2288 = dma.done.wait (%p2438_p8), %s606_s21, 512  }
  0x4a   : > { %2290 = vsyncadd (%p2438_p8), %s606_s21, 4294966784  ;;  %s615_s24 = sand.u32 1, %s2418_s11   ;;  %s2572_s13 = scalar_lea.vmem [#allocation5], %s2560_s26 }
  0x4b   : > { %s616_s25 = scalar_lea.sflag [#allocation6], %s615_s24 }
  0x4c   : > { %2292 = dma.done.wait (%p2438_p8), %s616_s25, 576  }
  0x4d   : > { %2294 = vsyncadd (%p2438_p8), %s616_s25, 4294966720  ;;  %s1797_s3 = sshll.u32 %s2557_s19, 2  ;;  %s636_s29 = scalar_lea.sflag [#allocation9], %s615_s24 }
  0x4e   : > { %s629_s14 = scalar_lea.vmem [#allocation7], %s1797_s3  ;;  %s2580_s20 = scalar_lea.vmem [#allocation8], %s2560_s26 }
  0x4f   : > { %2296 = dma.done.wait (%p2438_p8), %s636_s29, 576  }
  0x50   : > { %2298 = vsyncadd (%p2438_p8), %s636_s29, 4294966720  ;;  %s1800_s11 = sshll.u32 %s2557_s19, 3  ;;  %s2587_s16 = scalar_lea.vmem [#allocation10], %s1797_s3 }
  0x51   : > { %s656_s23 = scalar_lea.sflag [#allocation12], %s615_s24  ;;  %s2589_s15 = scalar_lea.vmem [#allocation11], %s1800_s11 }
  0x52   : > { %2300 = dma.done.wait (%p2438_p8), %s656_s23, 144  }
  0x53   : > { %2302 = vsyncadd (%p2438_p8), %s656_s23, 4294967152  ;;  %v956_v0 = vlaneseq  ;;  %v2597_v2 = vld [vmem:[%s2589_s15 + $0x1] ss:$0 sm:$0xff]  ;;  %v1941_v3 = vld [vmem:[%s2589_s15 + $0x2] ss:$0 sm:$0xff]  ;;  %s2339_s27 = smov 8  }
  0x54   : > { %v791_v4 = vld [vmem:[%s2572_s13] sm:$0xf]  ;;  %935 = vrot.lane.b32.xlu0 %v2597_v2, %s2339_s27  ;;  %v792_v8 = vld [vmem:[%s2572_s13 + $0x4] sm:$0xf]  ;;  %v793_v9 = vld [vmem:[%s2572_s13 + $0x8] sm:$0xf] }
  0x55   : > { %v957_v1 = vshrl.u32 %v956_v0, 7  ;;  %v815_v5 = vld [vmem:[%s629_s14] sm:$0xf]  ;;  %v825_v7 = vunpack.c.l.b16 %v791_v4  ;;  %v794_v10 = vld [vmem:[%s2572_s13 + $0xc] sm:$0xf]  ;;  %vm840_vm0 = vcmask 1043456   ;;  %v826_v11 = vunpack.c.l.b16 %v792_v8 }
  0x56   : > { %v824_v6 = vunpack.c.l.b16 %v815_v5  ;;  %v827_v12 = vunpack.c.l.b16 %v793_v9  ;;  %v828_v13 = vunpack.c.l.b16 %v794_v10  ;;  %vm1005_vm1 = vcmask 130048   ;;  %v796_v19 = vld [vmem:[%s2572_s13 + $0x14] sm:$0xf]  ;;  %v797_v20 = vld [vmem:[%s2572_s13 + $0x18] sm:$0xf]  ;;  %s668_s17 = scalar_lea.vmem [#allocation13], %s2557_s19 }
  0x57   : > { %1937 = vset.pattern.permute.xlu1 %v957_v1  ;;  %1938 = vset.pattern.permute.xlu0 %v957_v1  ;;  %v833_v15 = vpack.c.b16 %v825_v7, %v825_v7  ;;  %v834_v16 = vpack.c.b16 %v826_v11, %v826_v11  ;;  %v830_v23 = vunpack.c.l.b16 %v796_v19  ;;  %v831_v24 = vunpack.c.l.b16 %v797_v20  ;;  %v795_v25 = vld [vmem:[%s2572_s13 + $0x10] sm:$0xf]  ;;  %v798_v30 = vld [vmem:[%s2572_s13 + $0x1c] sm:$0xf]  ;;  %v1946_v41 = vld [vmem:[%s668_s17] ss:$0 sm:$0xff] }
  0x58   : > { %1939 = vset.pattern.permute.xlu2 %v957_v1  ;;  %v832_v14 = vpack.c.b16 %v824_v6, %v824_v6  ;;  %v835_v17 = vpack.c.b16 %v827_v12, %v827_v12  ;;  %v836_v18 = vpack.c.b16 %v828_v13, %v828_v13  ;;  %v1942_v35 = vld [vmem:[%s2589_s15 + $0x3] ss:$0 sm:$0xff]  ;;  %v829_v36 = vunpack.c.l.b16 %v795_v25  ;;  %v783_v45 = vld [vmem:[%s2564_s8] sm:$0xf]  ;;  %v784_v46 = vld [vmem:[%s2564_s8 + $0x4] sm:$0xf] }
  0x59   : > { %v846_v22 = vsel %vm840_vm0, %v792_v8, %v833_v15  ;;  %v849_v28 = vsel %vm840_vm0, %v793_v9, %v834_v16  ;;  %v838_v33 = vpack.c.b16 %v830_v23, %v830_v23  ;;  %v839_v34 = vpack.c.b16 %v831_v24, %v831_v24  ;;  %v785_v47 = vld [vmem:[%s2564_s8 + $0x8] sm:$0xf]  ;;  %v786_v48 = vld [vmem:[%s2564_s8 + $0xc] sm:$0xf]  ;;  %931 = vrot.lane.b32.xlu2 %v1946_v41, %s2339_s27  ;;  %v1943_v50 = vld [vmem:[%s2589_s15] ss:$0 sm:$0xff] }
  0x5a   : > { %v843_v21 = vsel %vm840_vm0, %v791_v4, %v832_v14  ;;  %v1027_v27 = vsel %vm1005_vm1, %v846_v22, 0  ;;  %v852_v29 = vsel %vm840_vm0, %v794_v10, %v835_v17  ;;  %v1045_v31 = vsel %vm1005_vm1, %v849_v28, 0  ;;  %v1944_v52 = vld [vmem:[%s2589_s15 + $0x7] ss:$0 sm:$0xff]  ;;  %v1945_v53 = vld [vmem:[%s2589_s15 + $0x6] ss:$0 sm:$0xff] }
  0x5b   : > { %v1009_v26 = vsel %vm1005_vm1, %v843_v21, 0  ;;  %1036 = vmatpush.bf16.xpose.msra.mxu1 %v1027_v27  ;;  %v1063_v32 = vsel %vm1005_vm1, %v852_v29, 0  ;;  %1054 = vmatpush.bf16.xpose.msra.mxu2 %v1045_v31  ;;  %v855_v37 = vsel %vm840_vm0, %v795_v25, %v836_v18  ;;  %v861_v38 = vsel %vm840_vm0, %v797_v20, %v838_v33  ;;  %v1948_v54 = vld [vmem:[%s2589_s15 + $0x5] ss:$0 sm:$0xff]  ;;  %v787_v55 = vld [vmem:[%s2564_s8 + $0x10] sm:$0xf] }
  0x5c   : > { %1018 = vmatpush.bf16.xpose.msra.mxu0 %v1009_v26  ;;  %1072 = vmatpush.bf16.xpose.msra.mxu3 %v1063_v32  ;;  %v864_v39 = vsel %vm840_vm0, %v798_v30, %v839_v34  ;;  %v1081_v40 = vsel %vm1005_vm1, %v855_v37, 0  ;;  %v1117_v42 = vsel %vm1005_vm1, %v861_v38, 0  ;;  %v837_v44 = vpack.c.b16 %v829_v36, %v829_v36  ;;  %v788_v56 = vld [vmem:[%s2564_s8 + $0x14] sm:$0xf]  ;;  %v789_v57 = vld [vmem:[%s2564_s8 + $0x18] sm:$0xf] }
  0x5d   : > { %937 = vrot.lane.b32.xlu0 %v1941_v3, %s2339_s27  ;;  %v1135_v43 = vsel %vm1005_vm1, %v864_v39, 0  ;;  %v790_v58 = vld [vmem:[%s2564_s8 + $0x1c] sm:$0xf]  ;;  %vm947_vm2 = vcmask 64512   ;;  %v809_v9 = vld [vmem:[%s2589_s15 + $0x2] sm:$0x1] }
  0x5e   : > { %v858_v49 = vsel %vm840_vm0, %v796_v19, %v837_v44  ;;  %v1947_v59 = vld [vmem:[%s2589_s15 + $0x4] ss:$0 sm:$0xff]  ;;  %v810_v10 = vld [vmem:[%s2589_s15 + $0x3] sm:$0x1]  ;;  %v808_v17 = vld [vmem:[%s2589_s15 + $0x1] sm:$0x1] }
  0x5f   : > { %972 = vperm.xlu1 %1937, %v1941_v3   ;;  %v1099_v51 = vsel %vm1005_vm1, %v858_v49, 0  ;;  %v807_v3 = vld [vmem:[%s2589_s15] sm:$0x1]  ;;  %v811_v30 = vld [vmem:[%s2589_s15 + $0x4] sm:$0x1]  ;;  %vm1406_vm11 = vcmask 125952  }
  0x60   : > { %v814_v36 = vld [vmem:[%s2589_s15 + $0x7] sm:$0x1]  ;;  %v813_v37 = vld [vmem:[%s2589_s15 + $0x6] sm:$0x1]  ;;  %s2771_s30 = scalar_lea.vmem [#allocation14], %s2560_s26  ;;  %s2929_s10 = sld [smem:[#allocation25_spill]] }
  0x61   : > { %933 = vrot.lane.b32.xlu2 %v1943_v50, %s2339_s27  ;;  %vm1452_vm12 = vcmask 130112   ;;  %s2930_s12 = sld [smem:[#allocation33_spill]]  ;;  %vm1456_vm13 = vcmask 195712   ;;  %vm1460_vm14 = vcmask 261312   ;;  %s1500_s26 = sshll.u32 %s2771_s30, 4  ;;  %vm1464_vm15 = vcmask 326912   ;;  %s2803_s26 = int_to_ptr.vmem [resolvable:$true] %s1500_s26 }
  0x62   : > { %1803 = vmatmul.msk.bf16.vlgmr.msra.gmra.mxu1 %vm1005_vm1, %v784_v46  ;;  %1804 = vmatmul.msk.bf16.vlgmr.msra.gmra.mxu2 %vm1005_vm1, %v785_v47  ;;  %v812_v47 = vld [vmem:[%s2589_s15 + $0x5] sm:$0x1]  ;;  %s2931_s25 = sld [smem:[#allocation34_spill]]  ;;  %s734_s3 = scalar_lea.vmem [#allocation15], %s2557_s19 }
  0x63   : > { %1126 = vmatpush.bf16.xpose.msrb.mxu2 %v1117_v42  ;;  %1802 = vmatmul.msk.bf16.vlgmr.msra.gmra.mxu0 %vm1005_vm1, %v783_v45  ;;  %s2812_s14 = sshll.u32 %s734_s3, 4  ;;  %s1482_s11 = scalar_lea.sflag [#allocation4], %s2557_s19  ;;  %s1518_s14 = int_to_ptr.vmem [resolvable:$true] %s2812_s14 }
  0x64   : > { %1090 = vmatpush.bf16.xpose.msrb.mxu0 %v1081_v40  ;;  %1144 = vmatpush.bf16.xpose.msrb.mxu3 %v1135_v43 }
  0x65   : > { %1805 = vmatmul.msk.bf16.vlgmr.msra.gmra.mxu3 %vm1005_vm1, %v786_v48  ;;  %1108 = vmatpush.bf16.xpose.msrb.mxu1 %v1099_v51 }
  0x66   : > { %960 = vperm.xlu0 %1938, %v1943_v50   ;;  %s1830_s1 = sshll.u32 %s2929_s10, 5 }
  0x67   : > { %978 = vperm.xlu1 %1937, %v1942_v35   ;;  %s2792_s7 = scalar_lea.hbm %s2930_s12, %s1830_s1  ;;  %s2227_s17 = scalar_lea.hbm %s2930_s12, 64 }
  0x68   : > { %s1502_s21 = sshll.u32 %s2792_s7, 4  ;;  %s1515_s13 = scalar_lea.hbm %s2931_s25, %s2929_s10  ;;  %s2805_s21 = int_to_ptr.hbm [resolvable:$true] %s1502_s21 }
  0x69   : > { %943 = vrot.lane.b32.xlu2 %v1948_v54, %s2339_s27  ;;  %s2814_s29 = sshll.u32 %s1515_s13, 4  ;;  %s1520_s29 = int_to_ptr.hbm [resolvable:$true] %s2814_s29 }
  0x6e   : > { %1003 = vperm.xlu0 %1938, %v1944_v52  }
  0x6f   : > { %966 = vperm.xlu1 %1937, %v2597_v2  }
  0x71   : > { %996 = vperm.xlu2 %1939, %v1945_v53  }
  0x72   : > { %1807 = vmatmul.msk.bf16.vlgmr.msrb.gmra.mxu1 %vm1005_vm1, %v788_v56  ;;  %1808 = vmatmul.msk.bf16.vlgmr.msrb.gmra.mxu2 %vm1005_vm1, %v789_v57 }
  0x73   : > { %1806 = vmatmul.msk.bf16.vlgmr.msrb.gmra.mxu0 %vm1005_vm1, %v787_v55 }
  0x75   : > { %1809 = vmatmul.msk.bf16.vlgmr.msrb.gmra.mxu3 %vm1005_vm1, %v790_v58 }
  0x76   : > { %984 = vperm.xlu0 %1938, %v1947_v59  }
  0x77   : > { %945 = vrot.lane.b32.xlu1 %v1945_v53, %s2339_s27 }
  0x79   : > { %941 = vrot.lane.b32.xlu2 %v1947_v59, %s2339_s27 }
  0x7f   : > { %939 = vrot.lane.b32.xlu1 %v1942_v35, %s2339_s27 }
  0x87   : > { %990 = vperm.xlu1 %1937, %v1948_v54  }
  0xb3   : > { %v932_v61 = vpop.permute.xlu2 %931 }
  0xb4   : > { %v948_v4 = vsel %vm947_vm2, %v807_v3, %v932_v61 }
  0xb5   : > { %v1150_v7 = vperm.slane %v948_v4, 0 }
  0xbb   : > { %v934_v1 = vpop.permute.xlu2 %933 }
  0xbc   : > { %v949_v22 = vsel %vm947_vm2, %v808_v17, %v934_v1 }
  0xbd   : > { %v1151_v31 = vperm.slane %v949_v22, 0 }
  0xc3   : > { %v944_v8 = vpop.permute.xlu2 %943 }
  0xc4   : > { %v954_v43 = vsel %vm947_vm2, %v813_v37, %v944_v8 }
  0xc5   : > { %v1156_v52 = vperm.slane %v954_v43, 0 }
  0xc6   : > { %v936_v60 = vpop.permute.xlu0 %935 }
  0xc7   : > { %v950_v11 = vsel %vm947_vm2, %v809_v9, %v936_v60  ;;  %v799_v9 = vld [vmem:[%s2580_s20] sm:$0xf] }
  0xc8   : > { %v1152_v18 = vperm.slane %v950_v11, 0  ;;  %v800_v11 = vld [vmem:[%s2580_s20 + $0x4] sm:$0xf]  ;;  %v875_v22 = vunpack.c.l.b16 %v799_v9 }
  0xcb   : > { %v997_v23 = vpop.permute.xlu2 %996 }
  0xcc   : > { %vm1164_vm8 = vcmp.eq.s32.totalorder %v997_v23, %v1156_v52  ;;  %v883_v23 = vpack.c.b16 %v875_v22, %v875_v22 }
  0xcf   : > { %v938_v63 = vpop.permute.xlu0 %937 }
  0xd0   : > { %v951_v12 = vsel %vm947_vm2, %v810_v10, %v938_v63  ;;  %v801_v10 = vld [vmem:[%s2580_s20 + $0x8] sm:$0xf] }
  0xd1   : > { %v973_v62 = vpop.permute.xlu1 %972  ;;  %v1153_v19 = vperm.slane %v951_v12, 0 }
  0xd2   : > { %vm1160_vm4 = vcmp.eq.s32.totalorder %v973_v62, %v1152_v18 }
  0xd3   : > { %v942_v49 = vpop.permute.xlu2 %941 }
  0xd4   : > { %v953_v54 = vsel %vm947_vm2, %v812_v47, %v942_v49 }
  0xd5   : > { %v1155_v56 = vperm.slane %v953_v54, 0 }
  0xd8   : > { %v961_v5 = vpop.permute.xlu0 %960 }
  0xd9   : > { %v979_v2 = vpop.permute.xlu1 %978  ;;  %vm1158_vm3 = vcmp.eq.s32.totalorder %v961_v5, %v1150_v7 }
  0xda   : > { %vm1161_vm5 = vcmp.eq.s32.totalorder %v979_v2, %v1153_v19 }
  0xdf   : > { %v1038_v14 = vpop.f32.mrf.mxu1 }
  0xe0   : > { %v1020_v13 = vpop.f32.mrf.mxu0  ;;  %v1004_v21 = vpop.permute.xlu0 %1003 }
  0xe1   : > { %v967_v6 = vpop.permute.xlu1 %966  ;;  %v2663_v15 = vsel %vm1158_vm3, -50000.0, %v1020_v13  ;;  %v877_v13 = vunpack.c.l.b16 %v801_v10  ;;  %vm1479_vm3 = vcmask 516096  }
  0xe2   : > { %v1174_v16 = vsel %vm1005_vm1, %v2663_v15, -inf  ;;  %vm1159_vm6 = vcmp.eq.s32.totalorder %v967_v6, %v1151_v31  ;;  %v865_v6 = vld [vmem:[%s2587_s16] sm:$0xf]  ;;  %s2221_s16 = sshra.s32 %s2805_s21, 4  ;;  %s2222_s16 = int_to_ptr.hbm [resolvable:$true] %s2221_s16 }
  0xe3   : > { %1175 = vmax.xlane.f32.xlu1 %v1174_v16  ;;  %v2681_v39 = vsel %vm1159_vm6, -50000.0, %v1038_v14  ;;  %v874_v7 = vunpack.c.l.b16 %v865_v6  ;;  %v876_v14 = vunpack.c.l.b16 %v800_v11  ;;  %v802_v16 = vld [vmem:[%s2580_s20 + $0xc] sm:$0xf]  ;;  %v885_v17 = vpack.c.b16 %v877_v13, %v877_v13  ;;  %s2223_s23 = scalar_lea.hbm %s2222_s16, 32  ;;  %p2228_p7 = scmp.lt.s32.totalorder %s2222_s16, %s2930_s12 }
  0xe4   : > { %v1177_v50 = vsel %vm1005_vm1, %v2681_v39, -inf  ;;  %p2224_p4 = scmp.ne.s32.totalorder %s2222_s16, %s2223_s23  ;;  %p2229_p8 = scmp.lt.s32.totalorder %s2227_s17, %s2223_s23 }
  0xe5   : > { %v1056_v24 = vpop.f32.mrf.mxu2  ;;  %v882_v8 = vpack.c.b16 %v874_v7, %v874_v7  ;;  %v884_v18 = vpack.c.b16 %v876_v14, %v876_v14  ;;  %v904_v19 = vsel %vm840_vm0, %v802_v16, %v885_v17 }
  0xe6   : > { %v2669_v26 = vsel %vm1160_vm4, -50000.0, %v1056_v24  ;;  %1312 = vmatpush.bf16.msra.mxu3 %v904_v19  ;;  %p2225_p5 = pnand %p2224_p4, %p2442_p9  ;;  %p2230_p10 = por %p2229_p8, %p2228_p7 }
  0xe7   : > { %v1040_v29 = vpop.f32.mrf.mxu1  ;;  %v1180_v33 = vsel %vm1005_vm1, %v2669_v26, -inf  ;;  %v892_v12 = vsel %vm840_vm0, %v799_v9, %v882_v8 }
  0xe8   : > { %v1074_v25 = vpop.f32.mrf.mxu3  ;;  %v1022_v28 = vpop.f32.mrf.mxu0  ;;  %1181 = vmax.xlane.f32.xlu2 %v1180_v33  ;;  %1264 = vmatpush.bf16.msra.mxu0 %v892_v12  ;;  %v805_v29 = vld [vmem:[%s2580_s20 + $0x18] sm:$0xf]  ;;  %v806_v33 = vld [vmem:[%s2580_s20 + $0x1c] sm:$0xf]  ;;  %p2226_p6 = pneg %p2225_p5 }
  0xe9   : > { %v946_v20 = vpop.permute.xlu1 %945  ;;  %v2671_v27 = vsel %vm1161_vm5, -50000.0, %v1074_v25  ;;  %v985_v40 = vpop.permute.xlu0 %984  ;;  %v896_v25 = vsel %vm840_vm0, %v800_v11, %v883_v23  ;;  %v803_v28 = vld [vmem:[%s2580_s20 + $0x10] sm:$0xf]  ;;  %v881_v31 = vunpack.c.l.b16 %v805_v29 }
  0xea   : > { %v1183_v32 = vsel %vm1005_vm1, %v2671_v27, -inf  ;;  %v955_v44 = vsel %vm947_vm2, %v814_v36, %v946_v20  ;;  %v900_v20 = vsel %vm840_vm0, %v801_v10, %v884_v18  ;;  %1280 = vmatpush.bf16.msra.mxu1 %v896_v25  ;;  %v879_v43 = vunpack.c.l.b16 %v803_v28  ;;  %p2231_p13 = pnand %p2230_p10, %p2226_p6 }
  0xeb   : > { %1184 = vmax.xlane.f32.xlu0 %v1183_v32  ;;  %v1157_v53 = vperm.slane %v955_v44, 0  ;;  %1296 = vmatpush.bf16.msra.mxu2 %v900_v20  ;;  %v804_v32 = vld [vmem:[%s2580_s20 + $0x14] sm:$0xf] }
  0xec   : > { %v887_v44 = vpack.c.b16 %v879_v43, %v879_v43 }
  0xed   : > { %v1058_v41 = vpop.f32.mrf.mxu2  ;;  %vm1165_vm9 = vcmp.eq.s32.totalorder %v1004_v21, %v1157_v53  ;;  %v878_v21 = vunpack.c.l.b16 %v802_v16 }
  0xee   : > { %v912_v49 = vsel %vm840_vm0, %v804_v32, %v887_v44 }
  0xef   : > { %v1110_v46 = vpop.f32.mrf.mxu1  ;;  %v886_v24 = vpack.c.b16 %v878_v21, %v878_v21  ;;  %1344 = vmatpush.bf16.msrb.mxu1 %v912_v49 }
  0xf0   : > { %v1076_v42 = vpop.f32.mrf.mxu3  ;;  %v1092_v45 = vpop.f32.mrf.mxu0  ;;  %1178 = vmax.xlane.f32.xlu2 %v1177_v50 }
  0xf1   : > { %v940_v34 = vpop.permute.xlu1 %939 }
  0xf2   : > { %v952_v35 = vsel %vm947_vm2, %v811_v30, %v940_v34  ;;  %v908_v30 = vsel %vm840_vm0, %v803_v28, %v886_v24  ;;  %v880_v34 = vunpack.c.l.b16 %v804_v32  ;;  %vm1476_vm2 = vcmask 523712  }
  0xf3   : > { %v1154_v38 = vperm.slane %v952_v35, 0  ;;  %1328 = vmatpush.bf16.msrb.mxu0 %v908_v30  ;;  %v889_v35 = vpack.c.b16 %v881_v31, %v881_v31 }
  0xf4   : > { %v888_v37 = vpack.c.b16 %v880_v34, %v880_v34 }
  0xf5   : > { %vm1162_vm7 = vcmp.eq.s32.totalorder %v985_v40, %v1154_v38  ;;  %v1128_v57 = vpop.f32.mrf.mxu2  ;;  %v920_v40 = vsel %vm840_vm0, %v806_v33, %v889_v35 }
  0xf6   : > { %v2686_v48 = vsel %vm1162_vm7, -50000.0, %v1092_v45  ;;  %v2693_v59 = vsel %vm1164_vm8, -50000.0, %v1128_v57  ;;  %1376 = vmatpush.bf16.msrb.mxu3 %v920_v40  ;;  %v916_v41 = vsel %vm840_vm0, %v805_v29, %v888_v37  ;;  %vm1468_vm0 = vcmask 392512  }
  0xf7   : > { %v1186_v51 = vsel %vm1005_vm1, %v2686_v48, -inf  ;;  %v1112_v62 = vpop.f32.mrf.mxu1  ;;  %v1192_v1 = vsel %vm1005_vm1, %v2693_v59, -inf  ;;  %1360 = vmatpush.bf16.msrb.mxu2 %v916_v41 }
  0xf8   : > { %1187 = vmax.xlane.f32.xlu1 %v1186_v51  ;;  %v1146_v58 = vpop.f32.mrf.mxu3  ;;  %v1094_v61 = vpop.f32.mrf.mxu0  ;;  %1193 = vmax.xlane.f32.xlu2 %v1192_v1 }
  0xf9   : > { %v991_v55 = vpop.permute.xlu1 %990  ;;  %v2695_v60 = vsel %vm1165_vm9, -50000.0, %v1146_v58 }
  0xfa   : > { %v1195_v63 = vsel %vm1005_vm1, %v2695_v60, -inf  ;;  %vm1163_vm10 = vcmp.eq.s32.totalorder %v991_v55, %v1155_v56 }
  0xfb   : > { %1196 = vmax.xlane.f32.xlu0 %v1195_v63  ;;  %v2701_v2 = vsel %vm1163_vm10, -50000.0, %v1110_v46 }
  0xfc   : > { %v1189_v5 = vsel %vm1005_vm1, %v2701_v2, -inf }
  0xfd   : > { %v1130_v3 = vpop.f32.mrf.mxu2 }
 0x100   : > { %v1148_v4 = vpop.f32.mrf.mxu3  ;;  %1190 = vmax.xlane.f32.xlu2 %v1189_v5 }
 0x156   : > { %v2719_v36 = vpop.xlane.xlu1 %1175 }
 0x157   : > { %v1198_v38 = vsub.f32 %v2663_v15, %v2719_v36 }
 0x159   : > { %v1206_v42 = vmul.f32 1.442695, %v1198_v38 }
 0x15b   : > { %1949 = vpow2.f32 %v1206_v42  ;;  %v2727_v46 = vpop.xlane.xlu2 %1181 }
 0x15c   : > { %v1200_v15 = vsub.f32 %v2669_v26, %v2727_v46 }
 0x15e   : > { %v2725_v45 = vpop.xlane.xlu0 %1184  ;;  %v1210_v51 = vmul.f32 1.442695, %v1200_v15 }
 0x15f   : > { %v1201_v47 = vsub.f32 %v2671_v27, %v2725_v45 }
 0x161   : > { %v1212_v50 = vmul.f32 1.442695, %v1201_v47  ;;  %v1950_v52 = vpop.eup %1949 }
 0x162   : > { %v1246_v53 = vpack.c.bf16 %v1950_v52, %v1950_v52  ;;  %v1222_v54 = vsel %vm1005_vm1, %v1950_v52, 0.0 }
 0x163   : > { %1951 = vpow2.f32 %v1212_v50  ;;  %1223 = vadd.xlane.f32.xlu0 %v1222_v54  ;;  %v2736_v55 = vpop.xlane.xlu2 %1178 }
 0x164   : > { %1953 = vpow2.f32 %v1210_v51  ;;  %1810 = vmatmul.msk.bf16.vlgmr.msra.gmra.mxu0 %vm1005_vm1, %v1246_v53  ;;  %v1199_v27 = vsub.f32 %v2681_v39, %v2736_v55 }
 0x166   : > { %v1208_v58 = vmul.f32 1.442695, %v1199_v27 }
 0x168   : > { %1955 = vpow2.f32 %v1208_v58 }
 0x169   : > { %v1952_v57 = vpop.eup %1951 }
 0x16a   : > { %v1954_v61 = vpop.eup %1953  ;;  %v1249_v62 = vpack.c.bf16 %v1952_v57, %v1952_v57  ;;  %v1231_v39 = vsel %vm1005_vm1, %v1952_v57, 0.0  ;;  %v1448_v57 = vand.u32 127, %v956_v0 }
 0x16b   : > { %v2740_v26 = vpop.xlane.xlu1 %1187  ;;  %v1248_v1 = vpack.c.bf16 %v1954_v61, %v1954_v61  ;;  %v1228_v3 = vsel %vm1005_vm1, %v1954_v61, 0.0  ;;  %1232 = vadd.xlane.f32.xlu0 %v1231_v39 }
 0x16c   : > { %v1202_v56 = vsub.f32 %v2686_v48, %v2740_v26  ;;  %1229 = vadd.xlane.f32.xlu2 %v1228_v3  ;;  %1813 = vmatmul.msk.bf16.vlgmr.msra.gmra.mxu3 %vm1005_vm1, %v1249_v62  ;;  %v2750_v48 = vpop.xlane.xlu2 %1193 }
 0x16d   : > { %1812 = vmatmul.msk.bf16.vlgmr.msra.gmra.mxu2 %vm1005_vm1, %v1248_v1  ;;  %v1204_v6 = vsub.f32 %v2693_v59, %v2750_v48  ;;  %v1450_v1 = vadd.s32 4294967288, %v1448_v57 }
 0x16e   : > { %v1214_v63 = vmul.f32 1.442695, %v1202_v56  ;;  %v2748_v4 = vpop.xlane.xlu0 %1196  ;;  %v1956_v7 = vpop.eup %1955 }
 0x16f   : > { %v1205_v5 = vsub.f32 %v2695_v60, %v2748_v4  ;;  %v1218_v9 = vmul.f32 1.442695, %v1204_v6  ;;  %v1247_v11 = vpack.c.bf16 %v1956_v7, %v1956_v7  ;;  %v1225_v12 = vsel %vm1005_vm1, %v1956_v7, 0.0 }
 0x170   : > { %1957 = vpow2.f32 %v1214_v63  ;;  %1226 = vadd.xlane.f32.xlu1 %v1225_v12 }
 0x171   : > { %v1220_v8 = vmul.f32 1.442695, %v1205_v5  ;;  %1811 = vmatmul.msk.bf16.vlgmr.msra.gmra.mxu1 %vm1005_vm1, %v1247_v11 }
 0x173   : > { %1959 = vpow2.f32 %v1220_v8 }
 0x174   : > { %1961 = vpow2.f32 %v1218_v9  ;;  %v2759_v14 = vpop.xlane.xlu2 %1190 }
 0x175   : > { %v1203_v59 = vsub.f32 %v2701_v2, %v2759_v14 }
 0x176   : > { %v1958_v10 = vpop.eup %1957 }
 0x177   : > { %v1250_v13 = vpack.c.bf16 %v1958_v10, %v1958_v10  ;;  %v1216_v16 = vmul.f32 1.442695, %v1203_v59  ;;  %v1234_v19 = vsel %vm1005_vm1, %v1958_v10, 0.0 }
 0x178   : > { %1235 = vadd.xlane.f32.xlu1 %v1234_v19 }
 0x179   : > { %1814 = vmatmul.msk.bf16.vlgmr.msrb.gmra.mxu0 %vm1005_vm1, %v1250_v13  ;;  %v1960_v60 = vpop.eup %1959  ;;  %1963 = vpow2.f32 %v1216_v16 }
 0x17a   : > { %v1962_v17 = vpop.eup %1961  ;;  %v1253_v18 = vpack.c.bf16 %v1960_v60, %v1960_v60  ;;  %v1243_v24 = vsel %vm1005_vm1, %v1960_v60, 0.0 }
 0x17b   : > { %v1252_v20 = vpack.c.bf16 %v1962_v17, %v1962_v17  ;;  %v1240_v21 = vsel %vm1005_vm1, %v1962_v17, 0.0  ;;  %v1454_v17 = vadd.s32 4294967280, %v1448_v57 }
 0x17c   : > { %1241 = vadd.xlane.f32.xlu0 %v1240_v21  ;;  %1817 = vmatmul.msk.bf16.vlgmr.msrb.gmra.mxu3 %vm1005_vm1, %v1253_v18  ;;  %v1462_v21 = vadd.s32 4294967264, %v1448_v57 }
 0x17d   : > { %1816 = vmatmul.msk.bf16.vlgmr.msrb.gmra.mxu2 %vm1005_vm1, %v1252_v20 }
 0x17f   : > { %v1964_v22 = vpop.eup %1963 }
 0x180   : > { %v1251_v23 = vpack.c.bf16 %v1964_v22, %v1964_v22  ;;  %v1237_v2 = vsel %vm1005_vm1, %v1964_v22, 0.0  ;;  %1244 = vadd.xlane.f32.xlu1 %v1243_v24 }
 0x181   : > { %1238 = vadd.xlane.f32.xlu2 %v1237_v2 }
 0x182   : > { %1815 = vmatmul.msk.bf16.vlgmr.msrb.gmra.mxu1 %vm1005_vm1, %v1251_v23  ;;  %vm1472_vm1 = vcmask 458112  }
 0x1d6   : > { %v1224_v25 = vpop.xlane.xlu0 %1223 }
 0x1d7   : > { %1965 = vrcp.f32 %v1224_v25 }
 0x1d8   : > { %1967 = vlog2.f32 %v1224_v25 }
 0x1dd   : > { %v1966_v28 = vpop.eup %1965 }
 0x1de   : > { %v1233_v32 = vpop.xlane.xlu0 %1232  ;;  %v1968_v37 = vpop.eup %1967 }
 0x1df   : > { %v1230_v34 = vpop.xlane.xlu2 %1229  ;;  %v1416_v58 = vmul.f32 0.6931472, %v1968_v37 }
 0x1e1   : > { %v1266_v29 = vpop.f32.mrf.mxu0  ;;  %v1431_v8 = vadd.f32 %v1416_v58, %v2719_v36 }
 0x1e2   : > { %v1390_v30 = vmul.f32 %v1966_v28, %v1266_v29  ;;  %v1470_v29 = vadd.s32 4294967248, %v1448_v57 }
 0x1e3   : > { %v1227_v33 = vpop.xlane.xlu1 %1226  ;;  %v1449_v19 = vperm.slane %v1431_v8, %v1448_v57 }
 0x1e4   : > { %v1398_v31 = vpack.c.bf16 %v1390_v30, %v1390_v30  ;;  %1969 = vlog2.f32 %v1227_v33 }
 0x1e5   : > { %1971 = vrcp.f32 %v1233_v32 }
 0x1e6   : > { %1407 = vst.msk [vmem:[%s2771_s30] sm:$0xf] %vm1406_vm11, %v1398_v31  ;;  %1973 = vrcp.f32 %v1230_v34 }
 0x1e7   : > { %1975 = vrcp.f32 %v1227_v33 }
 0x1e8   : > { %1977 = vlog2.f32 %v1230_v34 }
 0x1e9   : > { %v1268_v35 = vpop.f32.mrf.mxu0 }
 0x1ea   : > { %v1970_v38 = vpop.eup %1969 }
 0x1eb   : > { %v1236_v40 = vpop.xlane.xlu1 %1235  ;;  %v1972_v41 = vpop.eup %1971  ;;  %v1418_v50 = vmul.f32 0.6931472, %v1970_v38 }
 0x1ec   : > { %1979 = vrcp.f32 %v1236_v40  ;;  %v1974_v43 = vpop.eup %1973 }
 0x1ed   : > { %1981 = vlog2.f32 %v1233_v32  ;;  %v1976_v49 = vpop.eup %1975  ;;  %v1432_v3 = vadd.f32 %v1418_v50, %v2736_v55  ;;  %v1474_v32 = vadd.s32 4294967240, %v1448_v57 }
 0x1ee   : > { %v1282_v52 = vpop.f32.mrf.mxu1  ;;  %1983 = vlog2.f32 %v1236_v40  ;;  %v1978_v56 = vpop.eup %1977 }
 0x1ef   : > { %v1314_v42 = vpop.f32.mrf.mxu3  ;;  %v1242_v44 = vpop.xlane.xlu0 %1241  ;;  %v1391_v54 = vmul.f32 %v1976_v49, %v1282_v52  ;;  %v1420_v5 = vmul.f32 0.6931472, %v1978_v56  ;;  %v1451_v59 = vperm.slane %v1432_v3, %v1450_v1 }
 0x1f0   : > { %v1298_v47 = vpop.f32.mrf.mxu2  ;;  %v1393_v15 = vmul.f32 %v1972_v41, %v1314_v42  ;;  %1985 = vlog2.f32 %v1242_v44 }
 0x1f1   : > { %v1392_v51 = vmul.f32 %v1974_v43, %v1298_v47  ;;  %v1399_v62 = vpack.c.bf16 %v1391_v54, %v1391_v54  ;;  %1987 = vrcp.f32 %v1242_v44  ;;  %v1433_v18 = vadd.f32 %v1420_v5, %v2727_v46 }
 0x1f2   : > { %v1401_v53 = vpack.c.bf16 %v1393_v15, %v1393_v15  ;;  %v1980_v63 = vpop.eup %1979  ;;  %v1458_v46 = vadd.s32 4294967272, %v1448_v57  ;;  %v1453_v24 = vsel %vm1452_vm12, %v1451_v59, %v1449_v19 }
 0x1f3   : > { %v1400_v61 = vpack.c.bf16 %v1392_v51, %v1392_v51  ;;  %v1982_v39 = vpop.eup %1981  ;;  %1408 = vst.msk [vmem:[%s2771_s30 + $0x4] sm:$0xf] %vm1406_vm11, %v1399_v62  ;;  %v1245_v0 = vpop.xlane.xlu1 %1244  ;;  %v1455_v28 = vperm.slane %v1433_v18, %v1454_v17 }
 0x1f4   : > { %1410 = vst.msk [vmem:[%s2771_s30 + $0xc] sm:$0xf] %vm1406_vm11, %v1401_v53  ;;  %v1239_v7 = vpop.xlane.xlu2 %1238  ;;  %v1984_v10 = vpop.eup %1983  ;;  %v1422_v13 = vmul.f32 0.6931472, %v1982_v39 }
 0x1f5   : > { %1409 = vst.msk [vmem:[%s2771_s30 + $0x8] sm:$0xf] %vm1406_vm11, %v1400_v61  ;;  %1989 = vlog2.f32 %v1239_v7  ;;  %v1424_v60 = vmul.f32 0.6931472, %v1984_v10  ;;  %v1457_v35 = vsel %vm1456_vm13, %v1455_v28, %v1453_v24 }
 0x1f6   : > { %v1330_v27 = vpop.f32.mrf.mxu0  ;;  %v1986_v55 = vpop.eup %1985  ;;  %1991 = vrcp.f32 %v1245_v0  ;;  %v1434_v2 = vadd.f32 %v1422_v13, %v2725_v45 }
 0x1f7   : > { %v1394_v6 = vmul.f32 %v1980_v63, %v1330_v27  ;;  %v1316_v9 = vpop.f32.mrf.mxu3  ;;  %v1284_v16 = vpop.f32.mrf.mxu1  ;;  %1993 = vlog2.f32 %v1245_v0  ;;  %v1428_v20 = vmul.f32 0.6931472, %v1986_v55  ;;  %v1435_v22 = vadd.f32 %v1424_v60, %v2740_v26 }
 0x1f8   : > { %v1300_v12 = vpop.f32.mrf.mxu2  ;;  %1995 = vrcp.f32 %v1239_v7  ;;  %v1988_v23 = vpop.eup %1987  ;;  %v1466_v26 = vadd.s32 4294967256, %v1448_v57  ;;  %v1459_v42 = vperm.slane %v1434_v2, %v1458_v46 }
 0x1f9   : > { %v1402_v11 = vpack.c.bf16 %v1394_v6, %v1394_v6  ;;  %v1437_v37 = vadd.f32 %v1428_v20, %v2750_v48  ;;  %v1463_v45 = vperm.slane %v1435_v22, %v1462_v21 }
 0x1fa   : > { %v1461_v50 = vsel %vm1460_vm14, %v1459_v42, %v1457_v35 }
 0x1fb   : > { %1411 = vst.msk [vmem:[%s2771_s30 + $0x10] sm:$0xf] %vm1406_vm11, %v1402_v11  ;;  %v1990_v25 = vpop.eup %1989  ;;  %v1471_v53 = vperm.slane %v1437_v37, %v1470_v29  ;;  %v1465_v54 = vsel %vm1464_vm15, %v1463_v45, %v1461_v50 }
 0x1fc   : > { %v1992_v30 = vpop.eup %1991  ;;  %v1426_v31 = vmul.f32 0.6931472, %v1990_v25 }
 0x1fd   : > { %v1994_v34 = vpop.eup %1993 }
 0x1fe   : > { %v1332_v36 = vpop.f32.mrf.mxu0  ;;  %v1996_v41 = vpop.eup %1995  ;;  %v1436_v43 = vadd.f32 %v1426_v31, %v2759_v14  ;;  %v1430_v44 = vmul.f32 0.6931472, %v1994_v34 }
 0x1ff   : > { %v1378_v33 = vpop.f32.mrf.mxu3  ;;  %v1346_v15 = vpop.f32.mrf.mxu1 }
 0x200   : > { %v1362_v38 = vpop.f32.mrf.mxu2  ;;  %v1397_v40 = vmul.f32 %v1992_v30, %v1378_v33  ;;  %v1395_v48 = vmul.f32 %v1996_v41, %v1346_v15  ;;  %v1467_v51 = vperm.slane %v1436_v43, %v1466_v26  ;;  %v1438_v52 = vadd.f32 %v1430_v44, %v2748_v4 }
 0x201   : > { %v1396_v47 = vmul.f32 %v1988_v23, %v1362_v38 }
 0x202   : > { %v1405_v49 = vpack.c.bf16 %v1397_v40, %v1397_v40  ;;  %v1403_v27 = vpack.c.bf16 %v1395_v48, %v1395_v48  ;;  %v1469_v4 = vsel %vm1468_vm0, %v1467_v51, %v1465_v54  ;;  %v1475_v56 = vperm.slane %v1438_v52, %v1474_v32 }
 0x203   : > { %v1404_v14 = vpack.c.bf16 %v1396_v47, %v1396_v47  ;;  %v1473_v57 = vsel %vm1472_vm1, %v1471_v53, %v1469_v4 }
 0x204   : > { %1414 = vst.msk [vmem:[%s2771_s30 + $0x1c] sm:$0xf] %vm1406_vm11, %v1405_v49 }
 0x205   : > { %1413 = vst.msk [vmem:[%s2771_s30 + $0x18] sm:$0xf] %vm1406_vm11, %v1404_v14 }
 0x206   : > { %1412 = vst.msk [vmem:[%s2771_s30 + $0x14] sm:$0xf] %vm1406_vm11, %v1403_v27 }
 0x207   : > { %v1380_v58 = vpop.f32.mrf.mxu3 }
 0x208   : > { %2234 = shalt.err (!%p2231_p13)
}
 0x209   : > { %s2340_s30 = smov 64   ;;  %s2341_s18 = smov 4   ;;  %v1477_v61 = vsel %vm1476_vm2, %v1475_v56, %v1473_v57  ;;  %v1364_v62 = vpop.f32.mrf.mxu2  ;;  %v1348_v63 = vpop.f32.mrf.mxu1 }
 0x20a   : > { %1847 = dma.vmem_to_hbm [thread:$0]  (%p2442_p9), %s2803_s26, 512, %s2805_s21, %s1482_s11, %s2340_s30, %s2340_s30, %s2341_s18  }
 0x20b   : > { %1480 = vst.msk [vmem:[%s734_s3] sm:$0x1] %vm1479_vm3, %v1477_v61  ;;  %s1487_s22 = scalar_lea.sflag [#allocation16], %s2557_s19  ;;  %s2249_s7 = sshra.s32 %s1520_s29, 4  ;;  %s2250_s7 = int_to_ptr.hbm [resolvable:$true] %s2249_s7 }
 0x20c   : > { %s2251_s8 = scalar_lea.hbm %s2250_s7, 1  ;;  %s2255_s26 = scalar_lea.hbm %s2931_s25, 2 }
 0x20d   : > { %p2252_p0 = scmp.ne.s32.totalorder %s2250_s7, %s2251_s8  ;;  %p2256_p3 = scmp.lt.s32.totalorder %s2250_s7, %s2931_s25 }
 0x20e   : > { %p2257_p4 = scmp.lt.s32.totalorder %s2255_s26, %s2251_s8 }
 0x20f   : > { %p2253_p1 = pnand %p2252_p0, %p2442_p9 }
 0x210   : > { %p2258_p5 = por %p2257_p4, %p2256_p3 }
 0x211   : > { %p2254_p2 = pneg %p2253_p1 }
 0x213   : > { %p2259_p6 = pnand %p2258_p5, %p2254_p2 }
 0x215   : > { %2262 = shalt.err (!%p2259_p6)
}
 0x216   : > { %1848 = dma.vmem_to_hbm [thread:$0]  (%p2442_p9), %s1518_s14, 16, %s1520_s29, %s1487_s22  }
 0x217 PF: > { %s2933_s19 = sld [smem:[#allocation23_spill]]  ;;  %p1874_p7 = pnand %p1775_p12, %p2449_p11 }
 0x218   : > { %s2935_s16 = sld [smem:[#allocation26_spill]] }
 0x219   : > { %p1875_p8 = pneg %p1874_p7 }
 0x21d   : > { %s1531_s23 = sand.u32 1, %s2933_s19  }
 0x21e   : > { %s1532_s15 = scalar_lea.sflag [#allocation4], %s1531_s23 }
 0x21f   : > { %2304 = dma.done.wait (%p1875_p8), %s1532_s15, 512  }
 0x220   : > { %2306 = vsyncadd (%p1875_p8), %s1532_s15, 4294966784  ;;  %s1542_s27 = scalar_lea.sflag [#allocation16], %s1531_s23 }
 0x221   : > { %2308 = dma.done.wait (%p1875_p8), %s1542_s27, 16  }
 0x222   : > { %2310 = vsyncadd (%p1875_p8), %s1542_s27, 4294967280  ;;  %s37_s10 = sadd.s32 1, %s2935_s16   ;;  %s2936_s14 = sld [smem:[#allocation24_spill]] }
 0x223   : > { %p34_p10 = scmp.ge.s32.totalorder %s37_s10, 4   ;;  %s2937_s29 = sld [smem:[#allocation29_spill]] }
 0x224   : > { %s2938_s20 = sld [smem:[#allocation27_spill]]  ;;  %s2939_s27 = smov %s2317_s28 }
 0x225   : > { %s2941_s30 = smov %s2329_s9 }
 0x226   :  { %36 = sbr.rel (!%p34_p10) target bundleno = 19 (0x13), region = 182 }
 0x228   : > { %s2940_s28 = smov %s2936_s14 }
 0x22a   : > { %s2942_s9 = smov %s2938_s20 }
 0x22b   :  { %1547 = vsyncpa [#allocation3], 1 }
 0x22c   :  { %1549 = vsyncpa [#allocation3 + $0x1], 1 }
 0x22d   :  { %1550 = vsyncpa [#allocation6], 1 }
 0x22e   :  { %1552 = vsyncpa [#allocation6 + $0x1], 1 }
 0x22f   :  { %1553 = vsyncpa [#allocation9], 1 }
 0x230   :  { %1555 = vsyncpa [#allocation9 + $0x1], 1 }
 0x231   :  { %1556 = vsyncpa [#allocation12], 1 }
 0x232   :  { %1558 = vsyncpa [#allocation12 + $0x1], 1 }
 0x233   :  { %1559 = vsyncpa [#allocation4], 1 }
 0x234   :  { %1561 = vsyncpa [#allocation4 + $0x1], 1 }
 0x235   :  { %1562 = vsyncpa [#allocation16], 1 }
 0x236   :  { %1564 = vsyncpa [#allocation16 + $0x1], 1 }

</bundles_post_ra>
